<compile_context>
chip_gen: v5e
topology: v5e:2x2
jax: 0.10.0
libtpu: 0.0.40
codegen_flags: <defaults>
</compile_context>

<pallas_src>
import functools

import jax
import jax.numpy as jnp
from jax.experimental import pallas as pl
from jax.experimental.pallas import tpu as pltpu


def pam_kernel(x_ref, xp_ref, k_ref, wqg_ref, bqg_ref, out_ref, *, kd_pad, compute_dtype):
    # x_ref   : (1, C, TN)        current spatial tile, channel-first (input dtype)
    # xp_ref  : (1, C, Np)        pooled features (value), batch-resident, compute_dtype
    # k_ref   : (1, Np, Kd_pad)   precomputed key projection, batch-resident, compute_dtype
    # wqg_ref : (Kd_pad+1, C)     query conv rows 0..Kd-1, zeros, gamma conv at row Kd_pad
    # bqg_ref : (Kd_pad+1, 1)     matching biases (f32)
    cd = compute_dtype
    x = x_ref[0]                                            # (C, TN)

    # Fused query + gamma 1x1 conv: (Kd_pad+1, C) @ (C, TN) -> (Kd_pad+1, TN), f32 accum.
    qg = jnp.dot(wqg_ref[...], x.astype(cd),
                 preferred_element_type=jnp.float32) + bqg_ref[...]
    q = qg[:kd_pad, :].astype(cd)                           # (Kd_pad, TN)  8-aligned free view
    gamma = jax.nn.sigmoid(qg[kd_pad:kd_pad + 1, :])        # (1, TN)       8-aligned free view

    # energy^T[m, n] = <key[m], query[n]> : (Np, Kd_pad) @ (Kd_pad, TN) -> (Np, TN)
    # (padded key columns / query rows are zero, so the padding contributes nothing)
    energy_t = jnp.dot(k_ref[0], q, preferred_element_type=jnp.float32)

    # softmax over pooled positions (axis 0 of the transposed energy), normalization deferred
    e_max = jnp.max(energy_t, axis=0, keepdims=True)
    p = jnp.exp(energy_t - e_max)                           # (Np, TN) unnormalized
    denom = jnp.sum(p, axis=0, keepdims=True)               # (1, TN)

    # out_unnorm[c, n] = sum_m xp[c, m] * p[m, n] : (C, Np) @ (Np, TN) -> (C, TN)
    out_unnorm = jnp.dot(xp_ref[0], p.astype(cd), preferred_element_type=jnp.float32)

    # fold softmax normalization and (1 - gamma) into a single per-column scale
    scale = (1.0 - gamma) * pl.reciprocal(denom)            # exact; (1, TN) is essentially free
    out_ref[0] = (out_unnorm * scale + gamma * x.astype(jnp.float32)).astype(out_ref.dtype)


def _round_up(x, m):
    return (x + m - 1) // m * m


def _tile_budget():
    """(max spatial tile width, vmem_limit_bytes) adapted to the local chip's VMEM."""
    try:
        cap = pltpu.get_tpu_info().vmem_capacity_bytes
    except Exception:
        cap = 64 * 1024 * 1024  # conservative fallback (v7x-sized)
    if cap >= 128 * 1024 * 1024:        # v5e / v6e: 128 MiB physical VMEM
        return 1024, 64 * 1024 * 1024
    return 512, 32 * 1024 * 1024        # v7x: 64 MiB per TensorCore


def _pick_tile_n(n_pad, cap):
    """Largest multiple of 128 <= cap that divides n_pad (n_pad is a multiple of 128)."""
    tn = 128
    for cand in range(128, min(cap, n_pad) + 1, 128):
        if n_pad % cand == 0:
            tn = cand
    return tn


def pam_forward(x, wq, bq, wk, bk, wg, bg, *, compute_dtype=jnp.float32):
    """x: (B, C, H, W).  Weights follow the torch Conv2d convention:
    wq/wk: (key_dim, C), bq/bk: (key_dim,), wg: (1, C), bg: (1,).
    compute_dtype=bf16 is valid on all TPU generations (f32 accumulation is kept)."""
    B, C, H, W = x.shape
    # TODO(synk): assumes even H, W (MaxPool2d(2) with no padding), as in the module's usage.
    hp, wp = H // 2, W // 2
    N, Np = H * W, hp * wp
    Kd = wq.shape[0]
    Kd_pad = _round_up(Kd, 8)

    # --- plain-JAX glue (no transpose of the big x tensor) ---
    x_flat = x.reshape(B, C, N)                                   # free reshape
    xp = x.reshape(B, C, hp, 2, wp, 2).max(axis=(3, 5))           # MaxPool2d(2)
    xp_flat = xp.reshape(B, C, Np)                                # (B, C, Np)

    # Hoisted key projection (tiny, batch-only dependence), zero-padded to 8-aligned Kd.
    wk_pad = jnp.zeros((Kd_pad, C), wk.dtype).at[:Kd].set(wk)
    bk_pad = jnp.zeros((Kd_pad,), bk.dtype).at[:Kd].set(bk)
    k = jnp.einsum('bcm,kc->bmk', xp_flat, wk_pad,
                   precision=jax.lax.Precision.HIGHEST) + bk_pad[None, None, :]  # (B, Np, Kd_pad)

    # Fused query + gamma conv weights; gamma row sits at the 8-aligned index Kd_pad.
    wqg = jnp.zeros((Kd_pad + 1, C), wq.dtype).at[:Kd].set(wq).at[Kd_pad].set(wg[0])
    bqg = jnp.zeros((Kd_pad + 1,), bq.dtype).at[:Kd].set(bq).at[Kd_pad].set(bg[0])[:, None]

    # Pre-cast the batch-resident operands so no per-tile casts sit inside the kernel.
    xp_c = xp_flat.astype(compute_dtype)
    k_c = k.astype(compute_dtype)
    wqg_c = wqg.astype(compute_dtype)

    tn_cap, vmem_limit = _tile_budget()
    N_pad = _round_up(N, 128)
    if N_pad != N:
        x_flat = jnp.pad(x_flat, ((0, 0), (0, 0), (0, N_pad - N)))
    tn = _pick_tile_n(N_pad, tn_cap)
    grid = (B, N_pad // tn)
    # TODO(synk): for very large pooled maps (Np >= ~4096) on v7x, stream Np with an online
    # (flash-style) softmax instead of holding the full (Np, TN) intermediates in VMEM.

    out_flat = pl.pallas_call(
        functools.partial(pam_kernel, kd_pad=Kd_pad, compute_dtype=compute_dtype),
        out_shape=jax.ShapeDtypeStruct((B, C, N_pad), x.dtype),
        grid_spec=pltpu.PrefetchScalarGridSpec(
            num_scalar_prefetch=0,
            grid=grid,
            in_specs=[
                pl.BlockSpec((1, C, tn), lambda b, n: (b, 0, n)),         # x tile (streamed)
                pl.BlockSpec((1, C, Np), lambda b, n: (b, 0, 0)),         # xp value, resident
                pl.BlockSpec((1, Np, Kd_pad), lambda b, n: (b, 0, 0)),    # hoisted key, resident
                pl.BlockSpec((Kd_pad + 1, C), lambda b, n: (0, 0)),       # fused Wq|0|Wg
                pl.BlockSpec((Kd_pad + 1, 1), lambda b, n: (0, 0)),       # fused bq|0|bg
            ],
            out_specs=pl.BlockSpec((1, C, tn), lambda b, n: (b, 0, n)),
        ),
        compiler_params=pltpu.CompilerParams(
            dimension_semantics=("parallel", "parallel"),
            vmem_limit_bytes=vmem_limit,
        ),
    )(x_flat, xp_c, k_c, wqg_c, bqg)

    return out_flat[:, :, :N].reshape(B, C, H, W)                 # free reshape back to NCHW


def pam_reference(x, wq, bq, wk, bk, wg, bg):
    """Pure-JAX transcription of PAM_Module.forward (torch weight convention)."""
    B, C, H, W = x.shape
    hp, wp = H // 2, W // 2
    hi = jax.lax.Precision.HIGHEST
    xp = x.reshape(B, C, hp, 2, wp, 2).max(axis=(3, 5))
    q = jnp.einsum('kc,bchw->bkhw', wq, x, precision=hi) + bq.reshape(1, -1, 1, 1)
    k = jnp.einsum('kc,bchw->bkhw', wk, xp, precision=hi) + bk.reshape(1, -1, 1, 1)
    pq = jnp.transpose(q.reshape(B, -1, H * W), (0, 2, 1))          # (B, N, Kd)
    pk = k.reshape(B, -1, hp * wp)                                  # (B, Kd, Np)
    energy = jnp.einsum('bnk,bkm->bnm', pq, pk, precision=hi)       # (B, N, Np)
    att = jax.nn.softmax(energy, axis=-1)
    pv = xp.reshape(B, C, hp * wp)                                  # (B, C, Np)
    out = jnp.einsum('bcm,bnm->bcn', pv, att, precision=hi).reshape(B, C, H, W)
    g = jax.nn.sigmoid(jnp.einsum('c,bchw->bhw', wg.reshape(-1), x, precision=hi)
                       + bg.reshape(()))
    g = g[:, None, :, :]
    return (1.0 - g) * out + g * x


if __name__ == "__main__":
    B, C, H, W = 2, 8, 16, 16          # x: B x in_dim x H x W
    key_dim = 4                        # value_dim / out_dim / norm_layer unused in forward

    key = jax.random.PRNGKey(0)
    k0, k1, k2, k3, k4, k5, k6 = jax.random.split(key, 7)

    x = jax.random.normal(k0, (B, C, H, W), dtype=jnp.float32)

    # deterministic synthetic parameters (torch Conv2d layout: (C_out, C_in))
    wq = 0.2 * jax.random.normal(k1, (key_dim, C), dtype=jnp.float32)
    bq = 0.1 * jax.random.normal(k2, (key_dim,), dtype=jnp.float32)
    wk = 0.2 * jax.random.normal(k3, (key_dim, C), dtype=jnp.float32)
    bk = 0.1 * jax.random.normal(k4, (key_dim,), dtype=jnp.float32)
    wg = 0.2 * jax.random.normal(k5, (1, C), dtype=jnp.float32)
    bg = 0.1 * jax.random.normal(k6, (1,), dtype=jnp.float32)

    # compute_dtype=bf16 gives 2x MXU throughput on all generations; f32 here for a tight check
    out = jax.block_until_ready(pam_forward(x, wq, bq, wk, bk, wg, bg,
                                            compute_dtype=jnp.float32))
    ref = pam_reference(x, wq, bq, wk, bk, wg, bg)

    assert out.shape == (B, C, H, W)
    max_err = float(jnp.max(jnp.abs(out - ref)))
    assert jnp.allclose(out, ref, atol=5e-3, rtol=5e-3), f"mismatch vs reference: {max_err}"

    print("KERNEL_OK")
</pallas_src>

<mosaic_0001>
module attributes {stable_mosaic.version = 11 : i64} {
  func.func @pam_kernel(%arg0: i32, %arg1: i32, %arg2: memref<1x8x256xf32, #tpu.memory_space<vmem>>, %arg3: memref<1x8x64xf32, #tpu.memory_space<vmem>>, %arg4: memref<1x64x8xf32, #tpu.memory_space<vmem>>, %arg5: memref<9x8xf32, #tpu.memory_space<vmem>>, %arg6: memref<9x1xf32, #tpu.memory_space<vmem>>, %arg7: memref<1x8x256xf32, #tpu.memory_space<vmem>>) attributes {dimension_semantics = [#tpu.dimension_semantics<parallel>, #tpu.dimension_semantics<parallel>], iteration_bounds = array<i64: 2, 1>, scalar_prefetch = 0 : i64, scratch_operands = 0 : i64, tpu.core_type = #tpu.core_type<tc>, window_params = [{transform_indices = @transform_0, window_bounds = array<i64: 1, 8, 256>}, {transform_indices = @transform_1, window_bounds = array<i64: 1, 8, 64>}, {transform_indices = @transform_2, window_bounds = array<i64: 1, 64, 8>}, {pipeline_mode = #tpu.pipeline_mode<synchronous>, transform_indices = @transform_3, window_bounds = array<i64: 9, 8>}, {pipeline_mode = #tpu.pipeline_mode<synchronous>, transform_indices = @transform_4, window_bounds = array<i64: 9, 1>}, {transform_indices = @transform_5, window_bounds = array<i64: 1, 8, 256>}]} {
    %c0 = arith.constant 0 : index
    %c0_0 = arith.constant 0 : index
    %c0_1 = arith.constant 0 : index
    %0 = vector.load %arg2[%c0, %c0_0, %c0_1] : memref<1x8x256xf32, #tpu.memory_space<vmem>>, vector<1x8x256xf32>
    %1 = vector.shape_cast %0 : vector<1x8x256xf32> to vector<8x256xf32>
    %c0_2 = arith.constant 0 : index
    %c0_3 = arith.constant 0 : index
    %2 = vector.load %arg5[%c0_2, %c0_3] : memref<9x8xf32, #tpu.memory_space<vmem>>, vector<9x8xf32>
    %cst = arith.constant dense<0.000000e+00> : vector<9x256xf32>
    %3 = tpu.matmul %2, %1, %cst {dimension_numbers = #tpu.dot_dimension_numbers<[1], [0], [0], [1], [0, 0, 1, 1], [], []>} : vector<9x8xf32>, vector<8x256xf32>, vector<9x256xf32> -> vector<9x256xf32>
    %c0_4 = arith.constant 0 : index
    %c0_5 = arith.constant 0 : index
    %4 = vector.load %arg6[%c0_4, %c0_5] : memref<9x1xf32, #tpu.memory_space<vmem>>, vector<9x1xf32>
    %5 = vector.broadcast %4 : vector<9x1xf32> to vector<9x256xf32>
    %6 = arith.addf %3, %5 : vector<9x256xf32>
    %7 = vector.extract_strided_slice %6 {offsets = [0, 0], sizes = [8, 256], strides = [1, 1]} : vector<9x256xf32> to vector<8x256xf32>
    %8 = vector.extract_strided_slice %6 {offsets = [8, 0], sizes = [1, 256], strides = [1, 1]} : vector<9x256xf32> to vector<1x256xf32>
    %9 = arith.negf %8 : vector<1x256xf32>
    %10 = math.exp %9 : vector<1x256xf32>
    %cst_6 = arith.constant 1.000000e+00 : f32
    %11 = vector.broadcast %cst_6 : f32 to vector<1x256xf32>
    %12 = arith.addf %11, %10 : vector<1x256xf32>
    %13 = arith.divf %11, %12 : vector<1x256xf32>
    %c0_7 = arith.constant 0 : index
    %c0_8 = arith.constant 0 : index
    %c0_9 = arith.constant 0 : index
    %14 = vector.load %arg4[%c0_7, %c0_8, %c0_9] : memref<1x64x8xf32, #tpu.memory_space<vmem>>, vector<1x64x8xf32>
    %15 = vector.shape_cast %14 : vector<1x64x8xf32> to vector<64x8xf32>
    %cst_10 = arith.constant dense<0.000000e+00> : vector<64x256xf32>
    %16 = tpu.matmul %15, %7, %cst_10 {dimension_numbers = #tpu.dot_dimension_numbers<[1], [0], [0], [1], [0, 0, 1, 1], [], []>} : vector<64x8xf32>, vector<8x256xf32>, vector<64x256xf32> -> vector<64x256xf32>
    %cst_11 = arith.constant dense<0xFF800000> : vector<256xf32>
    %17 = vector.multi_reduction <maximumf>, %16, %cst_11 [0] : vector<64x256xf32> to vector<256xf32>
    %18 = vector.shape_cast %17 : vector<256xf32> to vector<1x256xf32>
    %19 = vector.broadcast %18 : vector<1x256xf32> to vector<64x256xf32>
    %20 = arith.subf %16, %19 : vector<64x256xf32>
    %21 = math.exp %20 : vector<64x256xf32>
    %cst_12 = arith.constant dense<0.000000e+00> : vector<256xf32>
    %22 = vector.multi_reduction <add>, %21, %cst_12 [0] : vector<64x256xf32> to vector<256xf32>
    %23 = vector.shape_cast %22 : vector<256xf32> to vector<1x256xf32>
    %c0_13 = arith.constant 0 : index
    %c0_14 = arith.constant 0 : index
    %c0_15 = arith.constant 0 : index
    %24 = vector.load %arg3[%c0_13, %c0_14, %c0_15] : memref<1x8x64xf32, #tpu.memory_space<vmem>>, vector<1x8x64xf32>
    %25 = vector.shape_cast %24 : vector<1x8x64xf32> to vector<8x64xf32>
    %cst_16 = arith.constant dense<0.000000e+00> : vector<8x256xf32>
    %26 = tpu.matmul %25, %21, %cst_16 {dimension_numbers = #tpu.dot_dimension_numbers<[1], [0], [0], [1], [0, 0, 1, 1], [], []>} : vector<8x64xf32>, vector<64x256xf32>, vector<8x256xf32> -> vector<8x256xf32>
    %cst_17 = arith.constant 1.000000e+00 : f32
    %27 = vector.broadcast %cst_17 : f32 to vector<1x256xf32>
    %28 = arith.subf %27, %13 : vector<1x256xf32>
    %29 = tpu.reciprocal %23 : vector<1x256xf32> -> vector<1x256xf32>
    %30 = arith.mulf %28, %29 : vector<1x256xf32>
    %31 = vector.broadcast %30 : vector<1x256xf32> to vector<8x256xf32>
    %32 = arith.mulf %26, %31 : vector<8x256xf32>
    %33 = vector.broadcast %13 : vector<1x256xf32> to vector<8x256xf32>
    %34 = arith.mulf %33, %1 : vector<8x256xf32>
    %35 = arith.addf %32, %34 : vector<8x256xf32>
    %c0_18 = arith.constant 0 : index
    %c0_19 = arith.constant 0 : index
    %c0_20 = arith.constant 0 : index
    %36 = vector.load %arg7[%c0_18, %c0_19, %c0_20] : memref<1x8x256xf32, #tpu.memory_space<vmem>>, vector<1x8x256xf32>
    %37 = vector.shape_cast %36 : vector<1x8x256xf32> to vector<8x256xf32>
    %38 = vector.shape_cast %35 : vector<8x256xf32> to vector<1x8x256xf32>
    tpu.vector_store %arg7[%c0_18, %c0_19, %c0_20], %38 {strides = array<i32>} : memref<1x8x256xf32, #tpu.memory_space<vmem>>, vector<1x8x256xf32>,
    return
  }
  func.func @transform_0(%arg0: i32, %arg1: i32) -> (i32, i32, i32) {
    %c0_i32 = arith.constant 0 : i32
    %c0_i32_0 = arith.constant 0 : i32
    return %arg0, %c0_i32, %arg1 : i32, i32, i32
  }
  func.func @transform_1(%arg0: i32, %arg1: i32) -> (i32, i32, i32) {
    %c0_i32 = arith.constant 0 : i32
    %c0_i32_0 = arith.constant 0 : i32
    %c0_i32_1 = arith.constant 0 : i32
    return %arg0, %c0_i32, %c0_i32_0 : i32, i32, i32
  }
  func.func @transform_2(%arg0: i32, %arg1: i32) -> (i32, i32, i32) {
    %c0_i32 = arith.constant 0 : i32
    %c0_i32_0 = arith.constant 0 : i32
    %c0_i32_1 = arith.constant 0 : i32
    return %arg0, %c0_i32, %c0_i32_0 : i32, i32, i32
  }
  func.func @transform_3(%arg0: i32, %arg1: i32) -> (i32, i32) {
    %c0_i32 = arith.constant 0 : i32
    %c0_i32_0 = arith.constant 0 : i32
    %c0_i32_1 = arith.constant 0 : i32
    return %c0_i32, %c0_i32_0 : i32, i32
  }
  func.func @transform_4(%arg0: i32, %arg1: i32) -> (i32, i32) {
    %c0_i32 = arith.constant 0 : i32
    %c0_i32_0 = arith.constant 0 : i32
    %c0_i32_1 = arith.constant 0 : i32
    return %c0_i32, %c0_i32_0 : i32, i32
  }
  func.func @transform_5(%arg0: i32, %arg1: i32) -> (i32, i32, i32) {
    %c0_i32 = arith.constant 0 : i32
    %c0_i32_0 = arith.constant 0 : i32
    return %arg0, %c0_i32, %arg1 : i32, i32, i32
  }
}

</mosaic_0001>

<bundles_post_ra>
// kernel: tpu_custom_call.1
= control target key start
LH: loop header
LB: loop body
LE: loop exit
PB: predicated region body
PF: predicated region fallthrough
CT: control target
= control target key end

     0   :  { %10 = vsyncpa [#allocation3], 0  ;;  %s1273_s0 = inlined_call_operand.vmem [shape: f32[2,8,256], index: 0, kind: input, shape index: {}]   ;;  %s1274_s1 = inlined_call_operand.vmem [shape: f32[2,8,64], index: 1, kind: input, shape index: {}]   ;;  %s1275_s2 = inlined_call_operand.vmem [shape: f32[2,64,8], index: 2, kind: input, shape index: {}]   ;;  %s1276_s3 = inlined_call_operand.vmem [shape: f32[9,8], index: 3, kind: input, shape index: {}]   ;;  %s1277_s4 = inlined_call_operand.vmem [shape: f32[9,1], index: 4, kind: input, shape index: {}]   ;;  %s1278_s5 = inlined_call_operand.hbm [shape: f32[2,8,256], index: 5, kind: output, shape index: {}]  }
   0x1   :  { %12 = vsyncpa [#allocation3 + $0x1], 0  ;;  %s1077_s18 = smov 0   ;;  %s1079_s19 = smov 0  }
   0x2   :  { %s1081_s20 = smov 0   ;;  %s1083_s21 = smov 0  }
   0x3   :  { %s1085_s22 = smov 0   ;;  %s1087_s23 = smov 0  }
   0x4 LB: > { %s820_s24 = sadd.s32 4294967295, %s1044_s23   ;;  %s821_s25 = sadd.s32 4294967294, %s1044_s23   ;;  %s1044_s23 = sphi %s1087_s23, %s18_s23   ;;  %s1040_s22 = sphi %s1085_s22, %s1285_s22   ;;  %s1036_s21 = sphi %s1083_s21, %s1284_s21   ;;  %s1032_s20 = sphi %s1081_s20, %s1283_s20   ;;  %s1028_s19 = sphi %s1079_s19, %s1282_s19   ;;  %s1024_s18 = sphi %s1077_s18, %s1281_s18  }
   0x5   : > { %s30_s26 = sadd.s32 1, %s1040_s22  ;;  %s161_s27 = sadd.s32 1, %s1032_s20 }
   0x6   : > { %p32_p0 = scmp.ge.s32.totalorder %s30_s26, 2  ;;  %p171_p1 = scmp.ne.s32.totalorder %s1032_s20, %s1028_s19 }
   0x7   : > { %p172_p2 = scmp.eq.s32.totalorder %s820_s24, 1  ;;  %p177_p3 = scmp.ne.s32.totalorder %s1028_s19, %s1024_s18 }
   0x8   : > { %s1287_s26 = smov (%p32_p0, %s30_s26), 0  ;;  %p178_p5 = scmp.eq.s32.totalorder %s821_s25, 1 }
   0x9   : > { %p1117_p4 = por %p172_p2, %p171_p1  ;;  %s156_s29 = ssub.s32 %s1040_s22, %s1287_s26 }
   0xa   : > { %p824_p6 = scmp.ge.s32.totalorder %s1044_s23, 1  ;;  %p159_p7 = scmp.eq.s32.totalorder %s156_s29, 0 }
   0xb   : > { %p1124_p8 = por %p178_p5, %p177_p3  ;;  %p230_p9 = scmp.lt.s32.totalorder %s1044_s23, 3 }
   0xc   : > { %s1130_s6 = scalar_select %p159_p7, %s1032_s20, %s161_s27  }
   0xd   : > { %p231_p10 = pnand %p824_p6, %p230_p9 }
   0xe   : > { %p272_p11 = scmp.lt.s32.totalorder (!%p231_p10), %s1036_s21, 1  ;;  %s862_s15 = sshll.u32 (!%p231_p10), %s1036_s21, 4 }
   0xf   : > { %234 = sbr.rel (%p231_p10) target bundleno = 516 (0x204), region = 40  ;;  %s715_s25 = scalar_lea.hbm (!%p231_p10), %s1278_s5, %s862_s15 }
  0x10   : > { %s719_s29 = sshll.u32 (!%p231_p10), %s715_s25, 4  ;;  %s986_s12 = scalar_lea.hbm (!%p231_p10), %s1278_s5, 32  ;;  %s720_s29 = int_to_ptr.hbm [resolvable:$true] %s719_s29 }
  0x11   : > { %s980_s7 = sshra.s32 (!%p231_p10), %s720_s29, 4  ;;  %s981_s7 = int_to_ptr.hbm [resolvable:$true] %s980_s7 }
  0x12   : > { %p987_p1 = scmp.lt.s32.totalorder (!%p231_p10), %s981_s7, %s1278_s5 }
  0x14   : > { %v295_v0 = vld [vmem:[%s1277_s4] sm:$0xff]  ;;  %v1046_v1 = vmov 0   ;;  %s1137_s9 = scalar_select %p272_p11, %s1036_s21, 1  ;;  %vm307_vm0 = vcmask 64512   ;;  %v296_v5 = vld [vmem:[%s1277_s4 + $0x8] sm:$0x1] }
  0x15   : > { %921 = vset.pattern.permute.xlu0 %v1046_v1  ;;  %v293_v2 = vld [vmem:[%s1276_s3] sm:$0xff]  ;;  %v294_v6 = vld [vmem:[%s1276_s3 + $0x8] sm:$0x1]  ;;  %vm613_vm1 = vcmask 523264  }
  0x16   : > { %299 = vperm.xlu0 %921, %v295_v0   ;;  %s860_s10 = sshll.u32 %s1137_s9, 4  ;;  %s861_s27 = sshll.u32 %s1137_s9, 6 }
  0x17   : > { %s279_s13 = scalar_lea.vmem %s1273_s0, %s860_s10  ;;  %s1166_s8 = scalar_lea.vmem %s1275_s2, %s861_s27 }
  0x18   : > { %v1146_v3 = vld [vmem:[%s279_s13] sm:$0xff]  ;;  %v1148_v4 = vld [vmem:[%s279_s13 + $0x8] sm:$0xff]  ;;  %v400_v12 = vld [vmem:[%s1166_s8 + $0x10] sm:$0xff]  ;;  %s828_s10 = sshll.u32 %s1137_s9, 3  ;;  %s268_s9 = sand.u32 1, %s1028_s19  }
  0x19   : > { %329 = vmatpush.msra.mxu0 %v1146_v3  ;;  %352 = vmatpush.msra.mxu1 %v1148_v4  ;;  %v398_v13 = vld [vmem:[%s1166_s8] sm:$0xff]  ;;  %v401_v14 = vld [vmem:[%s1166_s8 + $0x18] sm:$0xff]  ;;  %v399_v15 = vld [vmem:[%s1166_s8 + $0x8] sm:$0xff]  ;;  %s284_s13 = scalar_lea.vmem %s1274_s1, %s828_s10  ;;  %s825_s14 = sshll.u32 %s268_s9, 4 }
  0x1a   : > { %831 = vmatmul.msk.f32.vlgmr.msra.gmra.mxu0 %vm307_vm0, %v293_v2  ;;  %833 = vmatmul.msk.f32.vlgmr.msra.gmra.mxu1 %vm307_vm0, %v293_v2  ;;  %v402_v16 = vld [vmem:[%s1166_s8 + $0x20] sm:$0xff]  ;;  %v403_v17 = vld [vmem:[%s1166_s8 + $0x28] sm:$0xff]  ;;  %v404_v18 = vld [vmem:[%s1166_s8 + $0x30] sm:$0xff]  ;;  %s270_s16 = scalar_lea.vmem [#allocation2], %s825_s14  ;;  %s702_s21 = scalar_lea.sflag [#allocation3], %s268_s9 }
  0x1b   : > { %v405_v19 = vld [vmem:[%s1166_s8 + $0x38] sm:$0xff]  ;;  %s717_s27 = sshll.u32 %s270_s16, 4  ;;  %s982_s8 = scalar_lea.hbm %s981_s7, 16  ;;  %s718_s27 = int_to_ptr.vmem [resolvable:$true] %s717_s27 }
  0x1c   : > { %p983_p12 = scmp.ne.s32.totalorder %s981_s7, %s982_s8  ;;  %p988_p2 = scmp.lt.s32.totalorder %s986_s12, %s982_s8 }
  0x1e   : > { %304 = vperm.xlu0 %921, %v296_v5   ;;  %p984_p13 = pnand %p983_p12, %p1117_p4  ;;  %p989_p3 = por %p988_p2, %p987_p1 }
  0x20   : > { %p985_p0 = pneg %p984_p13 }
  0x22   : > { %832 = vmatmul.msk.f32.gmra.mxu0 %vm307_vm0, %v294_v6  ;;  %834 = vmatmul.msk.f32.gmra.mxu1 %vm307_vm0, %v294_v6  ;;  %p990_p5 = pnand %p989_p3, %p985_p0 }
  0x88   : > { %v300_v7 = vpop.permute.xlu0 %299 }
  0x97   : > { %v331_v8 = vpop.f32.mrf.mxu0  ;;  %v354_v9 = vpop.f32.mrf.mxu1 }
  0x98   : > { %v332_v10 = vadd.f32 %v331_v8, %v300_v7  ;;  %v355_v11 = vadd.f32 %v354_v9, %v300_v7 }
  0x9a   : > { %445 = vmatpush.msrb.mxu0 %v332_v10  ;;  %863 = vmatpush.msra.mxu2 %v332_v10 }
  0x9b   : > { %486 = vmatpush.msrb.mxu1 %v355_v11  ;;  %864 = vmatpush.msra.mxu3 %v355_v11 }
  0x9c   : > { %839 = vmatmul.msk.f32.vlgmr.msra.gmra.mxu2 %vm307_vm0, %v400_v12  ;;  %847 = vmatmul.msk.f32.vlgmr.msra.gmra.mxu3 %vm307_vm0, %v400_v12 }
  0x9d   : > { %837 = vmatmul.msk.f32.vlgmr.msrb.gmra.mxu0 %vm307_vm0, %v398_v13  ;;  %845 = vmatmul.msk.f32.vlgmr.msrb.gmra.mxu1 %vm307_vm0, %v398_v13 }
  0x9f   : > { %v1196_v24 = vpop.f32.mrf.mxu0  ;;  %v1198_v25 = vpop.f32.mrf.mxu1 }
  0xa4   : > { %840 = vmatmul.msk.f32.gmra.mxu2 %vm307_vm0, %v401_v14  ;;  %848 = vmatmul.msk.f32.gmra.mxu3 %vm307_vm0, %v401_v14 }
  0xa5   : > { %838 = vmatmul.msk.f32.gmra.mxu0 %vm307_vm0, %v399_v15  ;;  %846 = vmatmul.msk.f32.gmra.mxu1 %vm307_vm0, %v399_v15 }
  0xac   : > { %841 = vmatmul.msk.f32.gmra.mxu2 %vm307_vm0, %v402_v16  ;;  %849 = vmatmul.msk.f32.gmra.mxu3 %vm307_vm0, %v402_v16 }
  0xb4   : > { %842 = vmatmul.msk.f32.gmra.mxu2 %vm307_vm0, %v403_v17  ;;  %850 = vmatmul.msk.f32.gmra.mxu3 %vm307_vm0, %v403_v17 }
  0xbc   : > { %843 = vmatmul.msk.f32.gmra.mxu2 %vm307_vm0, %v404_v18  ;;  %851 = vmatmul.msk.f32.gmra.mxu3 %vm307_vm0, %v404_v18 }
  0xc4   : > { %844 = vmatmul.msk.f32.gmra.mxu2 %vm307_vm0, %v405_v19  ;;  %852 = vmatmul.msk.f32.gmra.mxu3 %vm307_vm0, %v405_v19 }
 0x11a   : > { %v447_v28 = vpop.f32.mrf.mxu0  ;;  %v488_v29 = vpop.f32.mrf.mxu1 }
 0x11f   : > { %v453_v20 = vpop.f32.mrf.mxu2  ;;  %v1192_v21 = vpop.f32.mrf.mxu3 }
 0x120   : > { %v512_v36 = vmax.f32 %v447_v28, %v453_v20  ;;  %v525_v37 = vmax.f32 %v488_v29, %v1192_v21 }
 0x122   : > { %v450_v34 = vpop.f32.mrf.mxu0  ;;  %v491_v35 = vpop.f32.mrf.mxu1 }
 0x127   : > { %v456_v22 = vpop.f32.mrf.mxu2  ;;  %v1194_v23 = vpop.f32.mrf.mxu3 }
 0x128   : > { %v513_v38 = vmax.f32 %v450_v34, %v456_v22  ;;  %v526_v39 = vmax.f32 %v491_v35, %v1194_v23 }
 0x12f   : > { %v459_v26 = vpop.f32.mrf.mxu2  ;;  %v1200_v27 = vpop.f32.mrf.mxu3 }
 0x130   : > { %v514_v40 = vmax.f32 %v512_v36, %v459_v26  ;;  %v527_v41 = vmax.f32 %v525_v37, %v1200_v27 }
 0x137   : > { %v462_v30 = vpop.f32.mrf.mxu2  ;;  %v1202_v31 = vpop.f32.mrf.mxu3 }
 0x138   : > { %v515_v42 = vmax.f32 %v513_v38, %v462_v30  ;;  %v528_v43 = vmax.f32 %v526_v39, %v1202_v31 }
 0x13f   : > { %v465_v32 = vpop.f32.mrf.mxu2  ;;  %v1204_v33 = vpop.f32.mrf.mxu3 }
 0x140   : > { %v516_v46 = vmax.f32 %v514_v40, %v465_v32  ;;  %v529_v47 = vmax.f32 %v527_v41, %v1204_v33 }
 0x147   : > { %v468_v44 = vpop.f32.mrf.mxu2  ;;  %v1210_v45 = vpop.f32.mrf.mxu3 }
 0x148   : > { %v517_v48 = vmax.f32 %v515_v42, %v468_v44  ;;  %v530_v49 = vmax.f32 %v528_v43, %v1210_v45 }
 0x14a   : > { %v518_v50 = vmax.f32 %v516_v46, %v517_v48  ;;  %v531_v51 = vmax.f32 %v529_v47, %v530_v49 }
 0x14c   : > { %v519_v52 = vrot.slane %v518_v50, 4  ;;  %v532_v53 = vrot.slane %v531_v51, 4 }
 0x14e   : > { %v520_v54 = vmax.f32 %v518_v50, %v519_v52  ;;  %v533_v55 = vmax.f32 %v531_v51, %v532_v53 }
 0x150   : > { %v521_v56 = vrot.slane %v520_v54, 2  ;;  %v534_v57 = vrot.slane %v533_v55, 2 }
 0x152   : > { %v522_v58 = vmax.f32 %v520_v54, %v521_v56  ;;  %v535_v59 = vmax.f32 %v533_v55, %v534_v57 }
 0x154   : > { %v523_v60 = vrot.slane %v522_v58, 1  ;;  %v536_v61 = vrot.slane %v535_v59, 1 }
 0x156   : > { %v524_v62 = vmax.f32 %v522_v58, %v523_v60  ;;  %v537_v63 = vmax.f32 %v535_v59, %v536_v61 }
 0x158   : > { %v538_v0 = vsub.f32 %v447_v28, %v524_v62  ;;  %v540_v1 = vsub.f32 %v450_v34, %v524_v62  ;;  %v542_v2 = vsub.f32 %v453_v20, %v524_v62  ;;  %v544_v5 = vsub.f32 %v456_v22, %v524_v62 }
 0x159   : > { %v546_v6 = vsub.f32 %v459_v26, %v524_v62  ;;  %v548_v7 = vsub.f32 %v462_v30, %v524_v62  ;;  %v550_v8 = vsub.f32 %v465_v32, %v524_v62  ;;  %v552_v12 = vsub.f32 %v468_v44, %v524_v62 }
 0x15a   : > { %v554_v9 = vmul.f32 1.442695, %v538_v0  ;;  %v558_v10 = vmul.f32 1.442695, %v540_v1  ;;  %v562_v11 = vmul.f32 1.442695, %v542_v2  ;;  %v539_v15 = vsub.f32 %v488_v29, %v537_v63 }
 0x15b   : > { %v566_v13 = vmul.f32 1.442695, %v544_v5  ;;  %v570_v14 = vmul.f32 1.442695, %v546_v6  ;;  %v574_v16 = vmul.f32 1.442695, %v548_v7  ;;  %v541_v17 = vsub.f32 %v491_v35, %v537_v63  ;;  %v305_v5 = vpop.permute.xlu0 %304 }
 0x15c   : > { %922 = vpow2.f32 %v554_v9  ;;  %v578_v18 = vmul.f32 1.442695, %v550_v8  ;;  %v582_v19 = vmul.f32 1.442695, %v552_v12  ;;  %v543_v20 = vsub.f32 %v1192_v21, %v537_v63  ;;  %v612_v1 = vld [vmem:[%s284_s13] sm:$0xff] }
 0x15d   : > { %924 = vpow2.f32 %v558_v10  ;;  %v556_v22 = vmul.f32 1.442695, %v539_v15  ;;  %v545_v26 = vsub.f32 %v1194_v23, %v537_v63  ;;  %v560_v28 = vmul.f32 1.442695, %v541_v17 }
 0x15e   : > { %926 = vpow2.f32 %v562_v11  ;;  %v547_v29 = vsub.f32 %v1200_v27, %v537_v63  ;;  %v553_v34 = vsub.f32 %v1210_v45, %v537_v63  ;;  %v564_v35 = vmul.f32 1.442695, %v543_v20 }
 0x15f   : > { %928 = vpow2.f32 %v566_v13  ;;  %v549_v21 = vsub.f32 %v1202_v31, %v537_v63  ;;  %v551_v23 = vsub.f32 %v1204_v33, %v537_v63  ;;  %v568_v39 = vmul.f32 1.442695, %v545_v26 }
 0x160   : > { %930 = vpow2.f32 %v570_v14  ;;  %v572_v42 = vmul.f32 1.442695, %v547_v29  ;;  %v584_v43 = vmul.f32 1.442695, %v553_v34  ;;  %v335_v7 = vadd.f32 %v1196_v24, %v305_v5 }
 0x161   : > { %932 = vpow2.f32 %v574_v16  ;;  %v576_v46 = vmul.f32 1.442695, %v549_v21  ;;  %v580_v48 = vmul.f32 1.442695, %v551_v23  ;;  %v358_v12 = vadd.f32 %v1198_v25, %v305_v5 }
 0x162   : > { %v1216_v30 = vpop.eup %922  ;;  %934 = vpow2.f32 %v578_v18  ;;  %v835_v9 = vmul.f32 -1.442695, %v335_v7 }
 0x163   : > { %v925_v32 = vpop.eup %924  ;;  %936 = vpow2.f32 %v582_v19  ;;  %v836_v15 = vmul.f32 -1.442695, %v358_v12 }
 0x164   : > { %v927_v36 = vpop.eup %926  ;;  %v586_v37 = vadd.f32 %v925_v32, %v1216_v30  ;;  %938 = vpow2.f32 %v556_v22 }
 0x165   : > { %v929_v38 = vpop.eup %928  ;;  %940 = vpow2.f32 %v560_v28 }
 0x166   : > { %v931_v40 = vpop.eup %930  ;;  %v587_v41 = vadd.f32 %v927_v36, %v586_v37  ;;  %942 = vpow2.f32 %v564_v35 }
 0x167   : > { %v933_v27 = vpop.eup %932  ;;  %944 = vpow2.f32 %v568_v39 }
 0x168   : > { %v935_v44 = vpop.eup %934  ;;  %v588_v45 = vadd.f32 %v929_v38, %v587_v41  ;;  %946 = vpow2.f32 %v572_v42 }
 0x169   : > { %v937_v47 = vpop.eup %936  ;;  %948 = vpow2.f32 %v584_v43 }
 0x16a   : > { %v939_v49 = vpop.eup %938  ;;  %v589_v31 = vadd.f32 %v931_v40, %v588_v45  ;;  %625 = vmatpush.msra.mxu0 %v937_v47  ;;  %950 = vpow2.f32 %v576_v46 }
 0x16b   : > { %v941_v50 = vpop.eup %940  ;;  %952 = vpow2.f32 %v580_v48 }
 0x16c   : > { %v590_v33 = vadd.f32 %v933_v27, %v589_v31  ;;  %v599_v51 = vadd.f32 %v941_v50, %v939_v49  ;;  %626 = vmatpush.msra.mxu0 %v935_v44  ;;  %v943_v52 = vpop.eup %942  ;;  %954 = vpow2.f32 %v835_v9 }
 0x16d   : > { %v945_v55 = vpop.eup %944  ;;  %956 = vpow2.f32 %v836_v15 }
 0x16e   : > { %v591_v53 = vadd.f32 %v935_v44, %v590_v33  ;;  %v600_v54 = vadd.f32 %v943_v52, %v599_v51  ;;  %627 = vmatpush.msra.mxu0 %v933_v27  ;;  %v947_v56 = vpop.eup %946 }
 0x16f   : > { %v949_v59 = vpop.eup %948 }
 0x170   : > { %v592_v57 = vadd.f32 %v937_v47, %v591_v53  ;;  %v601_v58 = vadd.f32 %v945_v55, %v600_v54  ;;  %628 = vmatpush.msra.mxu0 %v931_v40  ;;  %v951_v60 = vpop.eup %950  ;;  %645 = vmatpush.msra.mxu1 %v949_v59 }
 0x171   : > { %v953_v62 = vpop.eup %952 }
 0x172   : > { %v602_v61 = vadd.f32 %v947_v56, %v601_v58  ;;  %629 = vmatpush.msra.mxu0 %v929_v38  ;;  %646 = vmatpush.msra.mxu1 %v953_v62  ;;  %v593_v6 = vrot.slane %v592_v57, 4  ;;  %v955_v16 = vpop.eup %954 }
 0x173   : > { %v366_v19 = vadd.f32 1.0, %v955_v16  ;;  %v957_v26 = vpop.eup %956 }
 0x174   : > { %v603_v63 = vadd.f32 %v951_v60, %v602_v61  ;;  %630 = vmatpush.msra.mxu0 %v927_v36  ;;  %647 = vmatpush.msra.mxu1 %v951_v60  ;;  %v594_v8 = vadd.f32 %v593_v6, %v592_v57  ;;  %v367_v28 = vadd.f32 1.0, %v957_v26 }
 0x175   : > { %958 = vrcp.f32 %v366_v19  ;;  %vm373_vm3 = vweird.f32 %v366_v19  ;;  %v379_v27 = vand.u32 2147483648, %v366_v19  ;;  %v377_v43 = vand.u32 2147483647, %v366_v19 }
 0x176   : > { %v604_v0 = vadd.f32 %v953_v62, %v603_v63  ;;  %631 = vmatpush.msra.mxu0 %v925_v32  ;;  %648 = vmatpush.msra.mxu1 %v947_v56  ;;  %v595_v10 = vrot.slane %v594_v8, 2  ;;  %vm388_vm11 = vweird.f32 %v367_v28  ;;  %v392_v57 = vand.u32 2147483647, %v367_v28 }
 0x177   : > { %v380_v31 = vor.u32 1.1754944e-38, %v379_v27  ;;  %vm378_vm8 = vcmp.eq.f32.partialorder %v377_v43, 8.507059e+37 }
 0x178   : > { %v605_v2 = vadd.f32 %v949_v59, %v604_v0  ;;  %632 = vmatpush.msra.mxu0 %v1216_v30  ;;  %649 = vmatpush.msra.mxu1 %v945_v55  ;;  %v596_v13 = vadd.f32 %v595_v10, %v594_v8  ;;  %v394_v55 = vand.u32 2147483648, %v367_v28  ;;  %vm393_vm0 = vcmp.eq.f32.partialorder %v392_v57, 8.507059e+37 }
 0x179   : > { %853 = vmatmul.msk.f32.vlgmr.msra.gmra.mxu0 %vm613_vm1, %v612_v1 }
 0x17a   : > { %650 = vmatpush.msra.mxu1 %v943_v52  ;;  %v606_v11 = vrot.slane %v605_v2, 4  ;;  %v597_v17 = vrot.slane %v596_v13, 1  ;;  %v395_v63 = vor.u32 1.1754944e-38, %v394_v55 }
 0x17b   : > { %v959_v30 = vpop.eup %958 }
 0x17c   : > { %651 = vmatpush.msra.mxu1 %v941_v50  ;;  %v607_v14 = vadd.f32 %v606_v11, %v605_v2  ;;  %v598_v20 = vadd.f32 %v597_v17, %v596_v13  ;;  %v369_v25 = vmul.f32 %v959_v30, %v366_v19  ;;  %vm374_vm2 = vweird.f32 %v959_v30 }
 0x17d   : > { %vm375_vm5 = vmor %vm373_vm3, %vm374_vm2 }
 0x17e   : > { %652 = vmatpush.msra.mxu1 %v939_v49  ;;  %v608_v18 = vrot.slane %v607_v14, 2  ;;  %960 = vrcp.f32 %v598_v20  ;;  %v370_v35 = vsub.f32 1.0, %v369_v25  ;;  %v670_v46 = vand.u32 2147483648, %v598_v20 }
 0x17f   : > { %854 = vmatmul.msk.f32.vlgmr.msra.gmra.mxu1 %vm613_vm1, %v612_v1  ;;  %962 = vrcp.f32 %v367_v28  ;;  %vm664_vm6 = vweird.f32 %v598_v20  ;;  %v668_v48 = vand.u32 2147483647, %v598_v20 }
 0x180   : > { %v609_v22 = vadd.f32 %v608_v18, %v607_v14  ;;  %v371_v23 = vmul.f32 %v959_v30, %v370_v35  ;;  %v671_v52 = vor.u32 1.1754944e-38, %v670_v46 }
 0x181   : > { %vm669_vm9 = vcmp.eq.f32.partialorder %v668_v48, 8.507059e+37 }
 0x182   : > { %v610_v24 = vrot.slane %v609_v22, 1  ;;  %v372_v42 = vadd.f32 %v959_v30, %v371_v23 }
 0x184   : > { %v611_v29 = vadd.f32 %v610_v24, %v609_v22  ;;  %v961_v32 = vpop.eup %960  ;;  %v376_v47 = vsel %vm375_vm5, %v959_v30, %v372_v42 }
 0x185   : > { %v660_v34 = vmul.f32 %v961_v32, %v598_v20  ;;  %v963_v36 = vpop.eup %962  ;;  %vm665_vm4 = vweird.f32 %v961_v32  ;;  %v381_v51 = vsel %vm378_vm8, %v380_v31, %v376_v47 }
 0x186   : > { %964 = vrcp.f32 %v611_v29  ;;  %v384_v38 = vmul.f32 %v963_v36, %v367_v28  ;;  %vm666_vm7 = vmor %vm664_vm6, %vm665_vm4  ;;  %vm389_vm10 = vweird.f32 %v963_v36  ;;  %v657_v56 = vsub.f32 1.0, %v381_v51 }
 0x187   : > { %v661_v37 = vsub.f32 1.0, %v660_v34  ;;  %vm390_vm13 = vmor %vm388_vm11, %vm389_vm10  ;;  %v684_v59 = vand.u32 2147483648, %v611_v29  ;;  %vm678_vm14 = vweird.f32 %v611_v29  ;;  %v682_v62 = vand.u32 2147483647, %v611_v29 }
 0x188   : > { %v385_v41 = vsub.f32 1.0, %v384_v38  ;;  %v693_v0 = vperm.slane %v381_v51, 0 }
 0x189   : > { %v662_v39 = vmul.f32 %v961_v32, %v661_v37  ;;  %v685_v5 = vor.u32 1.1754944e-38, %v684_v59  ;;  %vm683_vm1 = vcmp.eq.f32.partialorder %v682_v62, 8.507059e+37 }
 0x18a   : > { %v386_v49 = vmul.f32 %v963_v36, %v385_v41  ;;  %v695_v10 = vmul.f32 %v693_v0, %v1146_v3 }
 0x18b   : > { %v663_v44 = vadd.f32 %v961_v32, %v662_v39 }
 0x18c   : > { %v965_v21 = vpop.eup %964  ;;  %v387_v53 = vadd.f32 %v963_v36, %v386_v49 }
 0x18d   : > { %v674_v40 = vmul.f32 %v965_v21, %v611_v29  ;;  %v667_v50 = vsel %vm666_vm7, %v961_v32, %v663_v44  ;;  %vm679_vm12 = vweird.f32 %v965_v21 }
 0x18e   : > { %v672_v54 = vsel %vm669_vm9, %v671_v52, %v667_v50  ;;  %v391_v61 = vsel %vm390_vm13, %v963_v36, %v387_v53  ;;  %vm680_vm15 = vmor %vm678_vm14, %vm679_vm12 }
 0x18f   : > { %v675_v45 = vsub.f32 1.0, %v674_v40  ;;  %v687_v60 = vmul.f32 %v672_v54, %v657_v56  ;;  %v396_v2 = vsel %vm393_vm0, %v395_v63, %v391_v61 }
 0x190   : > { %v658_v11 = vsub.f32 1.0, %v396_v2  ;;  %v694_v14 = vperm.slane %v396_v2, 0 }
 0x191   : > { %v676_v33 = vmul.f32 %v965_v21, %v675_v45  ;;  %v689_v6 = vperm.slane %v687_v60, 0 }
 0x192   : > { %v696_v3 = vmul.f32 %v694_v14, %v1148_v4 }
 0x193   : > { %v677_v58 = vadd.f32 %v965_v21, %v676_v33 }
 0x195   : > { %v681_v1 = vsel %vm680_vm15, %v965_v21, %v677_v58 }
 0x196   : > { %v686_v8 = vsel %vm683_vm1, %v685_v5, %v681_v1 }
 0x197   : > { %v688_v13 = vmul.f32 %v686_v8, %v658_v11 }
 0x199   : > { %v690_v15 = vperm.slane %v688_v13, 0 }
 0x1f6   : > { %v634_v7 = vpop.f32.mrf.mxu0 }
 0x1f7   : > { %v691_v9 = vmul.f32 %v689_v6, %v634_v7 }
 0x1f9   : > { %v697_v12 = vadd.f32 %v695_v10, %v691_v9 }
 0x1fb   : > { %699 = vst [vmem:[%s270_s16] sm:$0xff] %v697_v12 }
 0x1fc   : > { %v654_v16 = vpop.f32.mrf.mxu1 }
 0x1fd   : > { %v692_v17 = vmul.f32 %v690_v15, %v654_v16 }
 0x1ff   : > { %v698_v18 = vadd.f32 %v696_v3, %v692_v17 }
 0x201   : > { %700 = vst [vmem:[%s270_s16 + $0x8] sm:$0xff] %v698_v18 }
 0x202   : > { %993 = shalt.err (!%p990_p5)
}
 0x203   : > { %865 = dma.vmem_to_hbm [thread:$0]  (%p1117_p4), %s718_s27, 256, %s720_s29, %s702_s21  }
 0x204 PF: > { %p871_p6 = scmp.ge.s32.totalorder %s1044_s23, 2  ;;  %s731_s9 = sand.u32 1, %s1024_s18  }
 0x205   : > { %s732_s15 = scalar_lea.sflag [#allocation3], %s731_s9 }
 0x206   : > { %p868_p7 = pnand %p871_p6, %p1124_p8 }
 0x208   : > { %p869_p9 = pneg %p868_p7 }
 0x20a   : > { %1019 = dma.done.wait (%p869_p9), %s732_s15, 256  }
 0x20b   : > { %1021 = vsyncadd (%p869_p9), %s732_s15, 4294967040  ;;  %s18_s23 = sadd.s32 1, %s1044_s23   ;;  %s1281_s18 = smov %s1028_s19 }
 0x20c   : > { %p15_p10 = scmp.ge.s32.totalorder %s18_s23, 4   ;;  %s1282_s19 = smov %s1032_s20 }
 0x20d   : > { %s1283_s20 = smov %s1130_s6  ;;  %s1284_s21 = smov %s1040_s22 }
 0x20e   : > { %s1285_s22 = smov %s1287_s26  ;;  %17 = sbr.rel (!%p15_p10) target bundleno = 4 (0x4), region = 81 }
 0x213   :  { %738 = vsyncpa [#allocation3], 1 }
 0x214   :  { %740 = vsyncpa [#allocation3 + $0x1], 1 }

</bundles_post_ra>
